<compile_context>
chip_gen: v5e
topology: v5e:2x2
jax: 0.10.0
libtpu: 0.0.40
codegen_flags: <defaults>
</compile_context>

<pallas_src>
import functools

import jax
import jax.numpy as jnp
from jax import lax
from jax.experimental import pallas as pl
from jax.experimental.pallas import tpu as pltpu

EPS = 1e-5  # PyTorch InstanceNorm2d default


# ---------------------------------------------------------------------------
# in-kernel helpers (operate on VMEM-resident values)
# ---------------------------------------------------------------------------
def _instance_norm(y, inv_n):
    """y: (C, HW) f32 -> per-channel normalization over HW (single-pass stats)."""
    mean = jnp.sum(y, axis=1, keepdims=True) * inv_n
    mean_sq = jnp.sum(y * y, axis=1, keepdims=True) * inv_n
    var = jnp.maximum(mean_sq - mean * mean, 0.0)   # clamp cancellation
    return (y - mean) * lax.rsqrt(var + EPS)


def _conv3x3_reflect(x_flat, w_ref, masks, H, W, mxu_dtype):
    """ReflectionPad2d(1) + Conv2d(3x3, no bias) on a lane-dense (C_in, HW) tensor.

    Taps are built with XLU rolls on the flat HW axis + select fixups:
      * column taps (x±1): roll by ±1; at x==0 / x==W-1 the roll crosses a row
        boundary, and the reflected value x[.., 1] / x[.., W-2] is exactly the
        *other* roll's value there, so a single where() fixes wrap + reflection.
      * row taps (y±1): roll the column-fixed tensor by ±W; top/bottom rows are
        fixed the same way (reflect row -1 -> 1, row H -> H-2).

    w_ref: (9, C_out, C_in) ref, tap-major (index = dy*3 + dx), already mxu_dtype.
    Returns (C_out, HW) f32.
    """
    left, right, top, bottom = masks
    C, HW = x_flat.shape

    raw_m1 = pltpu.roll(x_flat, shift=1, axis=1)         # value at p-1
    raw_p1 = pltpu.roll(x_flat, shift=HW - 1, axis=1)    # value at p+1
    cols = (
        jnp.where(left, raw_p1, raw_m1),    # dx=0: x-1, reflected at x==0
        x_flat,                             # dx=1
        jnp.where(right, raw_m1, raw_p1),   # dx=2: x+1, reflected at x==W-1
    )

    acc = jnp.zeros((C, HW), jnp.float32)
    for dx in range(3):
        c = cols[dx]
        r_m1 = pltpu.roll(c, shift=W, axis=1)            # row y-1
        r_p1 = pltpu.roll(c, shift=HW - W, axis=1)       # row y+1
        rows = (
            jnp.where(top, r_p1, r_m1),     # dy=0: y-1, reflected at y==0
            c,                              # dy=1
            jnp.where(bottom, r_m1, r_p1),  # dy=2: y+1, reflected at y==H-1
        )
        for dy in range(3):
            tap = rows[dy].astype(mxu_dtype)
            acc = acc + jnp.dot(w_ref[dy * 3 + dx], tap,
                                preferred_element_type=jnp.float32)
    return acc


# ---------------------------------------------------------------------------
# fused kernel: one grid step == one batch element, whole block in VMEM
# ---------------------------------------------------------------------------
def resnet_block_kernel(x_ref, w1_ref, w2_ref, out_ref, *, H, W, mxu_dtype):
    HW = H * W
    inv_n = 1.0 / HW

    # edge masks on the flat HW (lane) axis, computed once, reused by both convs
    pos = lax.broadcasted_iota(jnp.int32, (1, HW), 1)
    is_pow2 = (W & (W - 1)) == 0
    col = (pos & (W - 1)) if is_pow2 else (pos % W)
    masks = (col == 0, col == W - 1, pos < W, pos >= (H - 1) * W)

    x = x_ref[0].astype(jnp.float32)                    # (C, HW), lane-dense

    # ---- stage 1: reflect-pad -> 3x3 conv -> InstanceNorm -> ReLU
    y1 = _conv3x3_reflect(x, w1_ref, masks, H, W, mxu_dtype)
    h = jnp.maximum(_instance_norm(y1, inv_n), 0.0)
    # TODO(synk): Dropout(0.5) would go here for use_dropout=True (inference path only).

    # ---- stage 2: reflect-pad -> 3x3 conv -> InstanceNorm, then residual add
    y2 = _conv3x3_reflect(h, w2_ref, masks, H, W, mxu_dtype)
    out_ref[0] = (x + _instance_norm(y2, inv_n)).astype(out_ref.dtype)


# ---------------------------------------------------------------------------
# wrapper
# ---------------------------------------------------------------------------
def _weights_to_taps(w, dtype):
    """PyTorch Conv2d weight (C_out, C_in, 3, 3) -> (9, C_out, C_in), tap idx dy*3+dx."""
    c_out, c_in = w.shape[0], w.shape[1]
    return jnp.transpose(w, (2, 3, 0, 1)).reshape(9, c_out, c_in).astype(dtype)


def resnet_block_forward(x, w1, w2, *, mxu_dtype=jnp.bfloat16):
    """x: (B, C, H, W) NCHW (same as PyTorch); w1/w2: (C, C, 3, 3) PyTorch layout.

    Conv bias is intentionally omitted: it is exactly canceled by the
    InstanceNorm2d(affine=False) mean subtraction that follows each conv.
    """
    B, C, H, W = x.shape
    HW = H * W
    x_flat = x.reshape(B, C, HW)               # free metadata reshape (contiguous NCHW)
    w1_t = _weights_to_taps(w1, mxu_dtype)
    w2_t = _weights_to_taps(w2, mxu_dtype)

    # explicit scoped-VMEM limit sized to the working set (default ~32 MiB is too small
    # for production dim=256 / 64x64); capped at v7x's 64 MiB physical VMEM.
    block_bytes = C * HW * 4
    w_bytes = 9 * C * C * jnp.dtype(mxu_dtype).itemsize
    est = 4 * block_bytes + 4 * w_bytes + 14 * block_bytes
    vmem_limit = int(min(max(est, 32 * 1024 * 1024), 64 * 1024 * 1024))

    out_flat = pl.pallas_call(
        functools.partial(resnet_block_kernel, H=H, W=W, mxu_dtype=mxu_dtype),
        out_shape=jax.ShapeDtypeStruct((B, C, HW), x.dtype),
        grid_spec=pltpu.PrefetchScalarGridSpec(
            num_scalar_prefetch=0,
            grid=(B,),
            in_specs=[
                pl.BlockSpec((1, C, HW), lambda n: (n, 0, 0)),   # x (also the residual)
                pl.BlockSpec((9, C, C), lambda n: (0, 0, 0)),    # conv1 tap weights
                pl.BlockSpec((9, C, C), lambda n: (0, 0, 0)),    # conv2 tap weights
            ],
            out_specs=pl.BlockSpec((1, C, HW), lambda n: (n, 0, 0)),
        ),
        compiler_params=pltpu.CompilerParams(
            dimension_semantics=("parallel",),
            vmem_limit_bytes=vmem_limit,
        ),
    )(x_flat, w1_t, w2_t)
    return out_flat.reshape(B, C, H, W)


# ---------------------------------------------------------------------------
# pure-JAX reference (same math) for a sanity check
# ---------------------------------------------------------------------------
def resnet_block_reference(x, w1, w2):
    def conv3x3(v, w):
        vp = jnp.pad(v, ((0, 0), (0, 0), (1, 1), (1, 1)), mode="reflect")
        return lax.conv_general_dilated(
            vp, w, window_strides=(1, 1), padding="VALID",
            dimension_numbers=("NCHW", "OIHW", "NCHW"),
            precision=lax.Precision.HIGHEST)

    def inorm(v):
        mean = jnp.mean(v, axis=(2, 3), keepdims=True)
        var = jnp.var(v, axis=(2, 3), keepdims=True)
        return (v - mean) * lax.rsqrt(var + EPS)

    h = jnp.maximum(inorm(conv3x3(x, w1)), 0.0)
    return x + inorm(conv3x3(h, w2))


def init_params(key, dim):
    k1, k2 = jax.random.split(key, 2)
    # PyTorch Conv2d weight layout: (C_out, C_in, kH, kW)
    w1 = jax.random.normal(k1, (dim, dim, 3, 3), jnp.float32) * 0.1
    w2 = jax.random.normal(k2, (dim, dim, 3, 3), jnp.float32) * 0.1
    return w1, w2


if __name__ == "__main__":
    key = jax.random.PRNGKey(0)
    k_x, k_p = jax.random.split(key)
    B, C, H, W = 2, 4, 16, 16          # ResnetBlock(dim=4), NCHW input
    x = jax.random.normal(k_x, (B, C, H, W), jnp.float32)
    w1, w2 = init_params(k_p, C)

    ref = jax.block_until_ready(resnet_block_reference(x, w1, w2))

    # f32 MXU path: tight numerical check of the roll-based tap construction
    out_f32 = jax.block_until_ready(
        resnet_block_forward(x, w1, w2, mxu_dtype=jnp.float32))
    assert out_f32.shape == (B, C, H, W)
    assert bool(jnp.all(jnp.isfinite(out_f32)))
    err_f32 = float(jnp.max(jnp.abs(out_f32 - ref)))
    assert err_f32 < 1e-3, f"f32 mismatch vs reference: {err_f32}"

    # bf16 MXU path (production default): looser tolerance (bf16 operands, f32 accum)
    out_bf16 = jax.block_until_ready(resnet_block_forward(x, w1, w2))
    assert out_bf16.shape == (B, C, H, W)
    assert bool(jnp.all(jnp.isfinite(out_bf16)))
    err_bf16 = float(jnp.max(jnp.abs(out_bf16 - ref)))
    assert err_bf16 < 2.5e-1, f"bf16 mismatch vs reference: {err_bf16}"

    print("KERNEL_OK")
</pallas_src>

<mosaic_0001>
module attributes {stable_mosaic.version = 11 : i64} {
  func.func @resnet_block_kernel(%arg0: i32, %arg1: memref<1x4x256xf32, #tpu.memory_space<vmem>>, %arg2: memref<9x4x4xf32, #tpu.memory_space<vmem>>, %arg3: memref<9x4x4xf32, #tpu.memory_space<vmem>>, %arg4: memref<1x4x256xf32, #tpu.memory_space<vmem>>) attributes {dimension_semantics = [#tpu.dimension_semantics<parallel>], iteration_bounds = array<i64: 2>, scalar_prefetch = 0 : i64, scratch_operands = 0 : i64, tpu.core_type = #tpu.core_type<tc>, window_params = [{transform_indices = @transform_0, window_bounds = array<i64: 1, 4, 256>}, {pipeline_mode = #tpu.pipeline_mode<synchronous>, transform_indices = @transform_1, window_bounds = array<i64: 9, 4, 4>}, {pipeline_mode = #tpu.pipeline_mode<synchronous>, transform_indices = @transform_2, window_bounds = array<i64: 9, 4, 4>}, {transform_indices = @transform_3, window_bounds = array<i64: 1, 4, 256>}]} {
    %0 = tpu.iota {dimensions = array<i32: 1>} : vector<1x256xi32>
    %c15_i32 = arith.constant 15 : i32
    %1 = vector.broadcast %c15_i32 : i32 to vector<1x256xi32>
    %2 = arith.andi %0, %1 : vector<1x256xi32>
    %c0_i32 = arith.constant 0 : i32
    %3 = vector.broadcast %c0_i32 : i32 to vector<1x256xi32>
    %4 = arith.cmpi eq, %2, %3 : vector<1x256xi32>
    %c15_i32_0 = arith.constant 15 : i32
    %5 = vector.broadcast %c15_i32_0 : i32 to vector<1x256xi32>
    %6 = arith.cmpi eq, %2, %5 : vector<1x256xi32>
    %c16_i32 = arith.constant 16 : i32
    %7 = vector.broadcast %c16_i32 : i32 to vector<1x256xi32>
    %8 = arith.cmpi slt, %0, %7 : vector<1x256xi32>
    %c240_i32 = arith.constant 240 : i32
    %9 = vector.broadcast %c240_i32 : i32 to vector<1x256xi32>
    %10 = arith.cmpi sge, %0, %9 : vector<1x256xi32>
    %c0 = arith.constant 0 : index
    %c0_1 = arith.constant 0 : index
    %c0_2 = arith.constant 0 : index
    %11 = vector.load %arg1[%c0, %c0_1, %c0_2] : memref<1x4x256xf32, #tpu.memory_space<vmem>>, vector<1x4x256xf32>
    %12 = vector.shape_cast %11 : vector<1x4x256xf32> to vector<4x256xf32>
    %c1_i32 = arith.constant 1 : i32
    %13 = tpu.dynamic_rotate %12 by %c1_i32 dim 1 : vector<4x256xf32>, i32 -> vector<4x256xf32>
    %c255_i32 = arith.constant 255 : i32
    %14 = tpu.dynamic_rotate %12 by %c255_i32 dim 1 : vector<4x256xf32>, i32 -> vector<4x256xf32>
    %15 = vector.shape_cast %4 : vector<1x256xi1> to vector<1x256xi1>
    %16 = vector.broadcast %15 : vector<1x256xi1> to vector<4x256xi1>
    %17 = arith.select %16, %14, %13 : vector<4x256xi1>, vector<4x256xf32>
    %18 = vector.shape_cast %6 : vector<1x256xi1> to vector<1x256xi1>
    %19 = vector.broadcast %18 : vector<1x256xi1> to vector<4x256xi1>
    %20 = arith.select %19, %13, %14 : vector<4x256xi1>, vector<4x256xf32>
    %cst = arith.constant 0.000000e+00 : f32
    %21 = vector.broadcast %cst : f32 to vector<4x256xf32>
    %c16_i32_3 = arith.constant 16 : i32
    %22 = tpu.dynamic_rotate %17 by %c16_i32_3 dim 1 : vector<4x256xf32>, i32 -> vector<4x256xf32>
    %c240_i32_4 = arith.constant 240 : i32
    %23 = tpu.dynamic_rotate %17 by %c240_i32_4 dim 1 : vector<4x256xf32>, i32 -> vector<4x256xf32>
    %24 = vector.shape_cast %8 : vector<1x256xi1> to vector<1x256xi1>
    %25 = vector.broadcast %24 : vector<1x256xi1> to vector<4x256xi1>
    %26 = arith.select %25, %23, %22 : vector<4x256xi1>, vector<4x256xf32>
    %27 = vector.shape_cast %10 : vector<1x256xi1> to vector<1x256xi1>
    %28 = vector.broadcast %27 : vector<1x256xi1> to vector<4x256xi1>
    %29 = arith.select %28, %22, %23 : vector<4x256xi1>, vector<4x256xf32>
    %c0_5 = arith.constant 0 : index
    %c0_6 = arith.constant 0 : index
    %c0_7 = arith.constant 0 : index
    %30 = vector.load %arg2[%c0_5, %c0_6, %c0_7] : memref<9x4x4xf32, #tpu.memory_space<vmem>>, vector<1x4x4xf32>
    %31 = vector.shape_cast %30 : vector<1x4x4xf32> to vector<4x4xf32>
    %cst_8 = arith.constant dense<0.000000e+00> : vector<4x256xf32>
    %32 = tpu.matmul %31, %26, %cst_8 {dimension_numbers = #tpu.dot_dimension_numbers<[1], [0], [0], [1], [0, 0, 1, 1], [], []>} : vector<4x4xf32>, vector<4x256xf32>, vector<4x256xf32> -> vector<4x256xf32>
    %33 = arith.addf %21, %32 : vector<4x256xf32>
    %c3 = arith.constant 3 : index
    %c0_9 = arith.constant 0 : index
    %c0_10 = arith.constant 0 : index
    %34 = vector.load %arg2[%c3, %c0_9, %c0_10] : memref<9x4x4xf32, #tpu.memory_space<vmem>>, vector<1x4x4xf32>
    %35 = vector.shape_cast %34 : vector<1x4x4xf32> to vector<4x4xf32>
    %cst_11 = arith.constant dense<0.000000e+00> : vector<4x256xf32>
    %36 = tpu.matmul %35, %17, %cst_11 {dimension_numbers = #tpu.dot_dimension_numbers<[1], [0], [0], [1], [0, 0, 1, 1], [], []>} : vector<4x4xf32>, vector<4x256xf32>, vector<4x256xf32> -> vector<4x256xf32>
    %37 = arith.addf %33, %36 : vector<4x256xf32>
    %c6 = arith.constant 6 : index
    %c0_12 = arith.constant 0 : index
    %c0_13 = arith.constant 0 : index
    %38 = vector.load %arg2[%c6, %c0_12, %c0_13] : memref<9x4x4xf32, #tpu.memory_space<vmem>>, vector<1x4x4xf32>
    %39 = vector.shape_cast %38 : vector<1x4x4xf32> to vector<4x4xf32>
    %cst_14 = arith.constant dense<0.000000e+00> : vector<4x256xf32>
    %40 = tpu.matmul %39, %29, %cst_14 {dimension_numbers = #tpu.dot_dimension_numbers<[1], [0], [0], [1], [0, 0, 1, 1], [], []>} : vector<4x4xf32>, vector<4x256xf32>, vector<4x256xf32> -> vector<4x256xf32>
    %41 = arith.addf %37, %40 : vector<4x256xf32>
    %c16_i32_15 = arith.constant 16 : i32
    %42 = tpu.dynamic_rotate %12 by %c16_i32_15 dim 1 : vector<4x256xf32>, i32 -> vector<4x256xf32>
    %c240_i32_16 = arith.constant 240 : i32
    %43 = tpu.dynamic_rotate %12 by %c240_i32_16 dim 1 : vector<4x256xf32>, i32 -> vector<4x256xf32>
    %44 = vector.shape_cast %8 : vector<1x256xi1> to vector<1x256xi1>
    %45 = vector.broadcast %44 : vector<1x256xi1> to vector<4x256xi1>
    %46 = arith.select %45, %43, %42 : vector<4x256xi1>, vector<4x256xf32>
    %47 = vector.shape_cast %10 : vector<1x256xi1> to vector<1x256xi1>
    %48 = vector.broadcast %47 : vector<1x256xi1> to vector<4x256xi1>
    %49 = arith.select %48, %42, %43 : vector<4x256xi1>, vector<4x256xf32>
    %c1 = arith.constant 1 : index
    %c0_17 = arith.constant 0 : index
    %c0_18 = arith.constant 0 : index
    %50 = vector.load %arg2[%c1, %c0_17, %c0_18] : memref<9x4x4xf32, #tpu.memory_space<vmem>>, vector<1x4x4xf32>
    %51 = vector.shape_cast %50 : vector<1x4x4xf32> to vector<4x4xf32>
    %cst_19 = arith.constant dense<0.000000e+00> : vector<4x256xf32>
    %52 = tpu.matmul %51, %46, %cst_19 {dimension_numbers = #tpu.dot_dimension_numbers<[1], [0], [0], [1], [0, 0, 1, 1], [], []>} : vector<4x4xf32>, vector<4x256xf32>, vector<4x256xf32> -> vector<4x256xf32>
    %53 = arith.addf %41, %52 : vector<4x256xf32>
    %c4 = arith.constant 4 : index
    %c0_20 = arith.constant 0 : index
    %c0_21 = arith.constant 0 : index
    %54 = vector.load %arg2[%c4, %c0_20, %c0_21] : memref<9x4x4xf32, #tpu.memory_space<vmem>>, vector<1x4x4xf32>
    %55 = vector.shape_cast %54 : vector<1x4x4xf32> to vector<4x4xf32>
    %cst_22 = arith.constant dense<0.000000e+00> : vector<4x256xf32>
    %56 = tpu.matmul %55, %12, %cst_22 {dimension_numbers = #tpu.dot_dimension_numbers<[1], [0], [0], [1], [0, 0, 1, 1], [], []>} : vector<4x4xf32>, vector<4x256xf32>, vector<4x256xf32> -> vector<4x256xf32>
    %57 = arith.addf %53, %56 : vector<4x256xf32>
    %c7 = arith.constant 7 : index
    %c0_23 = arith.constant 0 : index
    %c0_24 = arith.constant 0 : index
    %58 = vector.load %arg2[%c7, %c0_23, %c0_24] : memref<9x4x4xf32, #tpu.memory_space<vmem>>, vector<1x4x4xf32>
    %59 = vector.shape_cast %58 : vector<1x4x4xf32> to vector<4x4xf32>
    %cst_25 = arith.constant dense<0.000000e+00> : vector<4x256xf32>
    %60 = tpu.matmul %59, %49, %cst_25 {dimension_numbers = #tpu.dot_dimension_numbers<[1], [0], [0], [1], [0, 0, 1, 1], [], []>} : vector<4x4xf32>, vector<4x256xf32>, vector<4x256xf32> -> vector<4x256xf32>
    %61 = arith.addf %57, %60 : vector<4x256xf32>
    %c16_i32_26 = arith.constant 16 : i32
    %62 = tpu.dynamic_rotate %20 by %c16_i32_26 dim 1 : vector<4x256xf32>, i32 -> vector<4x256xf32>
    %c240_i32_27 = arith.constant 240 : i32
    %63 = tpu.dynamic_rotate %20 by %c240_i32_27 dim 1 : vector<4x256xf32>, i32 -> vector<4x256xf32>
    %64 = vector.shape_cast %8 : vector<1x256xi1> to vector<1x256xi1>
    %65 = vector.broadcast %64 : vector<1x256xi1> to vector<4x256xi1>
    %66 = arith.select %65, %63, %62 : vector<4x256xi1>, vector<4x256xf32>
    %67 = vector.shape_cast %10 : vector<1x256xi1> to vector<1x256xi1>
    %68 = vector.broadcast %67 : vector<1x256xi1> to vector<4x256xi1>
    %69 = arith.select %68, %62, %63 : vector<4x256xi1>, vector<4x256xf32>
    %c2 = arith.constant 2 : index
    %c0_28 = arith.constant 0 : index
    %c0_29 = arith.constant 0 : index
    %70 = vector.load %arg2[%c2, %c0_28, %c0_29] : memref<9x4x4xf32, #tpu.memory_space<vmem>>, vector<1x4x4xf32>
    %71 = vector.shape_cast %70 : vector<1x4x4xf32> to vector<4x4xf32>
    %cst_30 = arith.constant dense<0.000000e+00> : vector<4x256xf32>
    %72 = tpu.matmul %71, %66, %cst_30 {dimension_numbers = #tpu.dot_dimension_numbers<[1], [0], [0], [1], [0, 0, 1, 1], [], []>} : vector<4x4xf32>, vector<4x256xf32>, vector<4x256xf32> -> vector<4x256xf32>
    %73 = arith.addf %61, %72 : vector<4x256xf32>
    %c5 = arith.constant 5 : index
    %c0_31 = arith.constant 0 : index
    %c0_32 = arith.constant 0 : index
    %74 = vector.load %arg2[%c5, %c0_31, %c0_32] : memref<9x4x4xf32, #tpu.memory_space<vmem>>, vector<1x4x4xf32>
    %75 = vector.shape_cast %74 : vector<1x4x4xf32> to vector<4x4xf32>
    %cst_33 = arith.constant dense<0.000000e+00> : vector<4x256xf32>
    %76 = tpu.matmul %75, %20, %cst_33 {dimension_numbers = #tpu.dot_dimension_numbers<[1], [0], [0], [1], [0, 0, 1, 1], [], []>} : vector<4x4xf32>, vector<4x256xf32>, vector<4x256xf32> -> vector<4x256xf32>
    %77 = arith.addf %73, %76 : vector<4x256xf32>
    %c8 = arith.constant 8 : index
    %c0_34 = arith.constant 0 : index
    %c0_35 = arith.constant 0 : index
    %78 = vector.load %arg2[%c8, %c0_34, %c0_35] : memref<9x4x4xf32, #tpu.memory_space<vmem>>, vector<1x4x4xf32>
    %79 = vector.shape_cast %78 : vector<1x4x4xf32> to vector<4x4xf32>
    %cst_36 = arith.constant dense<0.000000e+00> : vector<4x256xf32>
    %80 = tpu.matmul %79, %69, %cst_36 {dimension_numbers = #tpu.dot_dimension_numbers<[1], [0], [0], [1], [0, 0, 1, 1], [], []>} : vector<4x4xf32>, vector<4x256xf32>, vector<4x256xf32> -> vector<4x256xf32>
    %81 = arith.addf %77, %80 : vector<4x256xf32>
    %cst_37 = arith.constant dense<0.000000e+00> : vector<4xf32>
    %82 = vector.multi_reduction <add>, %81, %cst_37 [1] : vector<4x256xf32> to vector<4xf32>
    %83 = vector.shape_cast %82 : vector<4xf32> to vector<4x1xf32>
    %cst_38 = arith.constant 3.906250e-03 : f32
    %84 = vector.broadcast %cst_38 : f32 to vector<4x1xf32>
    %85 = arith.mulf %83, %84 : vector<4x1xf32>
    %86 = arith.mulf %81, %81 : vector<4x256xf32>
    %cst_39 = arith.constant dense<0.000000e+00> : vector<4xf32>
    %87 = vector.multi_reduction <add>, %86, %cst_39 [1] : vector<4x256xf32> to vector<4xf32>
    %88 = vector.shape_cast %87 : vector<4xf32> to vector<4x1xf32>
    %cst_40 = arith.constant 3.906250e-03 : f32
    %89 = vector.broadcast %cst_40 : f32 to vector<4x1xf32>
    %90 = arith.mulf %88, %89 : vector<4x1xf32>
    %91 = arith.mulf %85, %85 : vector<4x1xf32>
    %92 = arith.subf %90, %91 : vector<4x1xf32>
    %cst_41 = arith.constant 0.000000e+00 : f32
    %93 = vector.broadcast %cst_41 : f32 to vector<4x1xf32>
    %94 = arith.maximumf %92, %93 : vector<4x1xf32>
    %95 = vector.broadcast %85 : vector<4x1xf32> to vector<4x256xf32>
    %96 = arith.subf %81, %95 : vector<4x256xf32>
    %cst_42 = arith.constant 9.99999974E-6 : f32
    %97 = vector.broadcast %cst_42 : f32 to vector<4x1xf32>
    %98 = arith.addf %94, %97 : vector<4x1xf32>
    %99 = math.rsqrt %98 : vector<4x1xf32>
    %100 = vector.broadcast %99 : vector<4x1xf32> to vector<4x256xf32>
    %101 = arith.mulf %96, %100 : vector<4x256xf32>
    %cst_43 = arith.constant 0.000000e+00 : f32
    %102 = vector.broadcast %cst_43 : f32 to vector<4x256xf32>
    %103 = arith.maximumf %101, %102 : vector<4x256xf32>
    %c1_i32_44 = arith.constant 1 : i32
    %104 = tpu.dynamic_rotate %103 by %c1_i32_44 dim 1 : vector<4x256xf32>, i32 -> vector<4x256xf32>
    %c255_i32_45 = arith.constant 255 : i32
    %105 = tpu.dynamic_rotate %103 by %c255_i32_45 dim 1 : vector<4x256xf32>, i32 -> vector<4x256xf32>
    %106 = vector.shape_cast %4 : vector<1x256xi1> to vector<1x256xi1>
    %107 = vector.broadcast %106 : vector<1x256xi1> to vector<4x256xi1>
    %108 = arith.select %107, %105, %104 : vector<4x256xi1>, vector<4x256xf32>
    %109 = vector.shape_cast %6 : vector<1x256xi1> to vector<1x256xi1>
    %110 = vector.broadcast %109 : vector<1x256xi1> to vector<4x256xi1>
    %111 = arith.select %110, %104, %105 : vector<4x256xi1>, vector<4x256xf32>
    %cst_46 = arith.constant 0.000000e+00 : f32
    %112 = vector.broadcast %cst_46 : f32 to vector<4x256xf32>
    %c16_i32_47 = arith.constant 16 : i32
    %113 = tpu.dynamic_rotate %108 by %c16_i32_47 dim 1 : vector<4x256xf32>, i32 -> vector<4x256xf32>
    %c240_i32_48 = arith.constant 240 : i32
    %114 = tpu.dynamic_rotate %108 by %c240_i32_48 dim 1 : vector<4x256xf32>, i32 -> vector<4x256xf32>
    %115 = vector.shape_cast %8 : vector<1x256xi1> to vector<1x256xi1>
    %116 = vector.broadcast %115 : vector<1x256xi1> to vector<4x256xi1>
    %117 = arith.select %116, %114, %113 : vector<4x256xi1>, vector<4x256xf32>
    %118 = vector.shape_cast %10 : vector<1x256xi1> to vector<1x256xi1>
    %119 = vector.broadcast %118 : vector<1x256xi1> to vector<4x256xi1>
    %120 = arith.select %119, %113, %114 : vector<4x256xi1>, vector<4x256xf32>
    %c0_49 = arith.constant 0 : index
    %c0_50 = arith.constant 0 : index
    %c0_51 = arith.constant 0 : index
    %121 = vector.load %arg3[%c0_49, %c0_50, %c0_51] : memref<9x4x4xf32, #tpu.memory_space<vmem>>, vector<1x4x4xf32>
    %122 = vector.shape_cast %121 : vector<1x4x4xf32> to vector<4x4xf32>
    %cst_52 = arith.constant dense<0.000000e+00> : vector<4x256xf32>
    %123 = tpu.matmul %122, %117, %cst_52 {dimension_numbers = #tpu.dot_dimension_numbers<[1], [0], [0], [1], [0, 0, 1, 1], [], []>} : vector<4x4xf32>, vector<4x256xf32>, vector<4x256xf32> -> vector<4x256xf32>
    %124 = arith.addf %112, %123 : vector<4x256xf32>
    %c3_53 = arith.constant 3 : index
    %c0_54 = arith.constant 0 : index
    %c0_55 = arith.constant 0 : index
    %125 = vector.load %arg3[%c3_53, %c0_54, %c0_55] : memref<9x4x4xf32, #tpu.memory_space<vmem>>, vector<1x4x4xf32>
    %126 = vector.shape_cast %125 : vector<1x4x4xf32> to vector<4x4xf32>
    %cst_56 = arith.constant dense<0.000000e+00> : vector<4x256xf32>
    %127 = tpu.matmul %126, %108, %cst_56 {dimension_numbers = #tpu.dot_dimension_numbers<[1], [0], [0], [1], [0, 0, 1, 1], [], []>} : vector<4x4xf32>, vector<4x256xf32>, vector<4x256xf32> -> vector<4x256xf32>
    %128 = arith.addf %124, %127 : vector<4x256xf32>
    %c6_57 = arith.constant 6 : index
    %c0_58 = arith.constant 0 : index
    %c0_59 = arith.constant 0 : index
    %129 = vector.load %arg3[%c6_57, %c0_58, %c0_59] : memref<9x4x4xf32, #tpu.memory_space<vmem>>, vector<1x4x4xf32>
    %130 = vector.shape_cast %129 : vector<1x4x4xf32> to vector<4x4xf32>
    %cst_60 = arith.constant dense<0.000000e+00> : vector<4x256xf32>
    %131 = tpu.matmul %130, %120, %cst_60 {dimension_numbers = #tpu.dot_dimension_numbers<[1], [0], [0], [1], [0, 0, 1, 1], [], []>} : vector<4x4xf32>, vector<4x256xf32>, vector<4x256xf32> -> vector<4x256xf32>
    %132 = arith.addf %128, %131 : vector<4x256xf32>
    %c16_i32_61 = arith.constant 16 : i32
    %133 = tpu.dynamic_rotate %103 by %c16_i32_61 dim 1 : vector<4x256xf32>, i32 -> vector<4x256xf32>
    %c240_i32_62 = arith.constant 240 : i32
    %134 = tpu.dynamic_rotate %103 by %c240_i32_62 dim 1 : vector<4x256xf32>, i32 -> vector<4x256xf32>
    %135 = vector.shape_cast %8 : vector<1x256xi1> to vector<1x256xi1>
    %136 = vector.broadcast %135 : vector<1x256xi1> to vector<4x256xi1>
    %137 = arith.select %136, %134, %133 : vector<4x256xi1>, vector<4x256xf32>
    %138 = vector.shape_cast %10 : vector<1x256xi1> to vector<1x256xi1>
    %139 = vector.broadcast %138 : vector<1x256xi1> to vector<4x256xi1>
    %140 = arith.select %139, %133, %134 : vector<4x256xi1>, vector<4x256xf32>
    %c1_63 = arith.constant 1 : index
    %c0_64 = arith.constant 0 : index
    %c0_65 = arith.constant 0 : index
    %141 = vector.load %arg3[%c1_63, %c0_64, %c0_65] : memref<9x4x4xf32, #tpu.memory_space<vmem>>, vector<1x4x4xf32>
    %142 = vector.shape_cast %141 : vector<1x4x4xf32> to vector<4x4xf32>
    %cst_66 = arith.constant dense<0.000000e+00> : vector<4x256xf32>
    %143 = tpu.matmul %142, %137, %cst_66 {dimension_numbers = #tpu.dot_dimension_numbers<[1], [0], [0], [1], [0, 0, 1, 1], [], []>} : vector<4x4xf32>, vector<4x256xf32>, vector<4x256xf32> -> vector<4x256xf32>
    %144 = arith.addf %132, %143 : vector<4x256xf32>
    %c4_67 = arith.constant 4 : index
    %c0_68 = arith.constant 0 : index
    %c0_69 = arith.constant 0 : index
    %145 = vector.load %arg3[%c4_67, %c0_68, %c0_69] : memref<9x4x4xf32, #tpu.memory_space<vmem>>, vector<1x4x4xf32>
    %146 = vector.shape_cast %145 : vector<1x4x4xf32> to vector<4x4xf32>
    %cst_70 = arith.constant dense<0.000000e+00> : vector<4x256xf32>
    %147 = tpu.matmul %146, %103, %cst_70 {dimension_numbers = #tpu.dot_dimension_numbers<[1], [0], [0], [1], [0, 0, 1, 1], [], []>} : vector<4x4xf32>, vector<4x256xf32>, vector<4x256xf32> -> vector<4x256xf32>
    %148 = arith.addf %144, %147 : vector<4x256xf32>
    %c7_71 = arith.constant 7 : index
    %c0_72 = arith.constant 0 : index
    %c0_73 = arith.constant 0 : index
    %149 = vector.load %arg3[%c7_71, %c0_72, %c0_73] : memref<9x4x4xf32, #tpu.memory_space<vmem>>, vector<1x4x4xf32>
    %150 = vector.shape_cast %149 : vector<1x4x4xf32> to vector<4x4xf32>
    %cst_74 = arith.constant dense<0.000000e+00> : vector<4x256xf32>
    %151 = tpu.matmul %150, %140, %cst_74 {dimension_numbers = #tpu.dot_dimension_numbers<[1], [0], [0], [1], [0, 0, 1, 1], [], []>} : vector<4x4xf32>, vector<4x256xf32>, vector<4x256xf32> -> vector<4x256xf32>
    %152 = arith.addf %148, %151 : vector<4x256xf32>
    %c16_i32_75 = arith.constant 16 : i32
    %153 = tpu.dynamic_rotate %111 by %c16_i32_75 dim 1 : vector<4x256xf32>, i32 -> vector<4x256xf32>
    %c240_i32_76 = arith.constant 240 : i32
    %154 = tpu.dynamic_rotate %111 by %c240_i32_76 dim 1 : vector<4x256xf32>, i32 -> vector<4x256xf32>
    %155 = vector.shape_cast %8 : vector<1x256xi1> to vector<1x256xi1>
    %156 = vector.broadcast %155 : vector<1x256xi1> to vector<4x256xi1>
    %157 = arith.select %156, %154, %153 : vector<4x256xi1>, vector<4x256xf32>
    %158 = vector.shape_cast %10 : vector<1x256xi1> to vector<1x256xi1>
    %159 = vector.broadcast %158 : vector<1x256xi1> to vector<4x256xi1>
    %160 = arith.select %159, %153, %154 : vector<4x256xi1>, vector<4x256xf32>
    %c2_77 = arith.constant 2 : index
    %c0_78 = arith.constant 0 : index
    %c0_79 = arith.constant 0 : index
    %161 = vector.load %arg3[%c2_77, %c0_78, %c0_79] : memref<9x4x4xf32, #tpu.memory_space<vmem>>, vector<1x4x4xf32>
    %162 = vector.shape_cast %161 : vector<1x4x4xf32> to vector<4x4xf32>
    %cst_80 = arith.constant dense<0.000000e+00> : vector<4x256xf32>
    %163 = tpu.matmul %162, %157, %cst_80 {dimension_numbers = #tpu.dot_dimension_numbers<[1], [0], [0], [1], [0, 0, 1, 1], [], []>} : vector<4x4xf32>, vector<4x256xf32>, vector<4x256xf32> -> vector<4x256xf32>
    %164 = arith.addf %152, %163 : vector<4x256xf32>
    %c5_81 = arith.constant 5 : index
    %c0_82 = arith.constant 0 : index
    %c0_83 = arith.constant 0 : index
    %165 = vector.load %arg3[%c5_81, %c0_82, %c0_83] : memref<9x4x4xf32, #tpu.memory_space<vmem>>, vector<1x4x4xf32>
    %166 = vector.shape_cast %165 : vector<1x4x4xf32> to vector<4x4xf32>
    %cst_84 = arith.constant dense<0.000000e+00> : vector<4x256xf32>
    %167 = tpu.matmul %166, %111, %cst_84 {dimension_numbers = #tpu.dot_dimension_numbers<[1], [0], [0], [1], [0, 0, 1, 1], [], []>} : vector<4x4xf32>, vector<4x256xf32>, vector<4x256xf32> -> vector<4x256xf32>
    %168 = arith.addf %164, %167 : vector<4x256xf32>
    %c8_85 = arith.constant 8 : index
    %c0_86 = arith.constant 0 : index
    %c0_87 = arith.constant 0 : index
    %169 = vector.load %arg3[%c8_85, %c0_86, %c0_87] : memref<9x4x4xf32, #tpu.memory_space<vmem>>, vector<1x4x4xf32>
    %170 = vector.shape_cast %169 : vector<1x4x4xf32> to vector<4x4xf32>
    %cst_88 = arith.constant dense<0.000000e+00> : vector<4x256xf32>
    %171 = tpu.matmul %170, %160, %cst_88 {dimension_numbers = #tpu.dot_dimension_numbers<[1], [0], [0], [1], [0, 0, 1, 1], [], []>} : vector<4x4xf32>, vector<4x256xf32>, vector<4x256xf32> -> vector<4x256xf32>
    %172 = arith.addf %168, %171 : vector<4x256xf32>
    %cst_89 = arith.constant dense<0.000000e+00> : vector<4xf32>
    %173 = vector.multi_reduction <add>, %172, %cst_89 [1] : vector<4x256xf32> to vector<4xf32>
    %174 = vector.shape_cast %173 : vector<4xf32> to vector<4x1xf32>
    %cst_90 = arith.constant 3.906250e-03 : f32
    %175 = vector.broadcast %cst_90 : f32 to vector<4x1xf32>
    %176 = arith.mulf %174, %175 : vector<4x1xf32>
    %177 = arith.mulf %172, %172 : vector<4x256xf32>
    %cst_91 = arith.constant dense<0.000000e+00> : vector<4xf32>
    %178 = vector.multi_reduction <add>, %177, %cst_91 [1] : vector<4x256xf32> to vector<4xf32>
    %179 = vector.shape_cast %178 : vector<4xf32> to vector<4x1xf32>
    %cst_92 = arith.constant 3.906250e-03 : f32
    %180 = vector.broadcast %cst_92 : f32 to vector<4x1xf32>
    %181 = arith.mulf %179, %180 : vector<4x1xf32>
    %182 = arith.mulf %176, %176 : vector<4x1xf32>
    %183 = arith.subf %181, %182 : vector<4x1xf32>
    %cst_93 = arith.constant 0.000000e+00 : f32
    %184 = vector.broadcast %cst_93 : f32 to vector<4x1xf32>
    %185 = arith.maximumf %183, %184 : vector<4x1xf32>
    %186 = vector.broadcast %176 : vector<4x1xf32> to vector<4x256xf32>
    %187 = arith.subf %172, %186 : vector<4x256xf32>
    %cst_94 = arith.constant 9.99999974E-6 : f32
    %188 = vector.broadcast %cst_94 : f32 to vector<4x1xf32>
    %189 = arith.addf %185, %188 : vector<4x1xf32>
    %190 = math.rsqrt %189 : vector<4x1xf32>
    %191 = vector.broadcast %190 : vector<4x1xf32> to vector<4x256xf32>
    %192 = arith.mulf %187, %191 : vector<4x256xf32>
    %193 = arith.addf %12, %192 : vector<4x256xf32>
    %c0_95 = arith.constant 0 : index
    %c0_96 = arith.constant 0 : index
    %c0_97 = arith.constant 0 : index
    %194 = vector.load %arg4[%c0_95, %c0_96, %c0_97] : memref<1x4x256xf32, #tpu.memory_space<vmem>>, vector<1x4x256xf32>
    %195 = vector.shape_cast %194 : vector<1x4x256xf32> to vector<4x256xf32>
    %196 = vector.shape_cast %193 : vector<4x256xf32> to vector<1x4x256xf32>
    tpu.vector_store %arg4[%c0_95, %c0_96, %c0_97], %196 {strides = array<i32>} : memref<1x4x256xf32, #tpu.memory_space<vmem>>, vector<1x4x256xf32>,
    return
  }
  func.func @transform_0(%arg0: i32) -> (i32, i32, i32) {
    %c0_i32 = arith.constant 0 : i32
    %c0_i32_0 = arith.constant 0 : i32
    %c0_i32_1 = arith.constant 0 : i32
    return %arg0, %c0_i32, %c0_i32_0 : i32, i32, i32
  }
  func.func @transform_1(%arg0: i32) -> (i32, i32, i32) {
    %c0_i32 = arith.constant 0 : i32
    %c0_i32_0 = arith.constant 0 : i32
    %c0_i32_1 = arith.constant 0 : i32
    %c0_i32_2 = arith.constant 0 : i32
    return %c0_i32, %c0_i32_0, %c0_i32_1 : i32, i32, i32
  }
  func.func @transform_2(%arg0: i32) -> (i32, i32, i32) {
    %c0_i32 = arith.constant 0 : i32
    %c0_i32_0 = arith.constant 0 : i32
    %c0_i32_1 = arith.constant 0 : i32
    %c0_i32_2 = arith.constant 0 : i32
    return %c0_i32, %c0_i32_0, %c0_i32_1 : i32, i32, i32
  }
  func.func @transform_3(%arg0: i32) -> (i32, i32, i32) {
    %c0_i32 = arith.constant 0 : i32
    %c0_i32_0 = arith.constant 0 : i32
    %c0_i32_1 = arith.constant 0 : i32
    return %arg0, %c0_i32, %c0_i32_0 : i32, i32, i32
  }
}

</mosaic_0001>

<bundles_post_ra>
// kernel: tpu_custom_call.1
= control target key start
LH: loop header
LB: loop body
LE: loop exit
PB: predicated region body
PF: predicated region fallthrough
CT: control target
= control target key end

     0   :  { %8 = vsyncpa [#allocation3], 0  ;;  %s2090_s0 = inlined_call_operand.vmem [shape: f32[2,4,256], index: 0, kind: input, shape index: {}]   ;;  %s2091_s1 = inlined_call_operand.vmem [shape: f32[9,4,4], index: 1, kind: input, shape index: {}]   ;;  %s2092_s2 = inlined_call_operand.vmem [shape: f32[9,4,4], index: 2, kind: input, shape index: {}]   ;;  %s2093_s3 = inlined_call_operand.hbm [shape: f32[2,4,256], index: 3, kind: output, shape index: {}]  }
   0x1   :  { %10 = vsyncpa [#allocation3 + $0x1], 0  ;;  %s1684_s12 = smov 0   ;;  %s1686_s13 = smov 0  }
   0x2   :  { %s1688_s14 = smov 0   ;;  %s1690_s15 = smov 0  }
   0x3 LB: > { %s1705_s16 = sadd.s32 4294967295, %s1658_s15   ;;  %s1447_s17 = sadd.s32 4294967294, %s1658_s15   ;;  %s1658_s15 = sphi %s1690_s15, %s2107_s15   ;;  %s1654_s14 = sphi %s1688_s14, %s2106_s14   ;;  %s1650_s13 = sphi %s1686_s13, %s2105_s13   ;;  %s1646_s12 = sphi %s1684_s12, %s2104_s12  }
   0x4   : > { %s1709_s18 = sadd.s32 1, %s1658_s15   ;;  %s91_s19 = sadd.s32 1, %s1654_s14 }
   0x5   : > { %s88_s20 = ssub.s32 %s1658_s15, %s1709_s18  ;;  %p101_p0 = scmp.ne.s32.totalorder %s1654_s14, %s1650_s13 }
   0x6   : > { %p89_p1 = scmp.eq.s32.totalorder %s88_s20, 0  ;;  %p102_p2 = scmp.eq.s32.totalorder %s1705_s16, 1 }
   0x7   : > { %p107_p3 = scmp.ne.s32.totalorder %s1650_s13, %s1646_s12  ;;  %p108_p4 = scmp.eq.s32.totalorder %s1447_s17, 1 }
   0x8   : > { %s1720_s21 = scalar_select %p89_p1, %s1654_s14, %s91_s19  }
   0x9   : > { %p1722_p5 = por %p102_p2, %p101_p0  ;;  %p1726_p6 = por %p108_p4, %p107_p3 }
   0xa   : > { %p1450_p7 = scmp.ge.s32.totalorder %s1658_s15, 1  ;;  %p140_p8 = scmp.lt.s32.totalorder %s1658_s15, 3 }
   0xc   : > { %p141_p9 = pnand %p1450_p7, %p140_p8 }
   0xd   : > { %p164_p10 = scmp.lt.s32.totalorder (!%p141_p9), %s1705_s16, 1  ;;  %s1660_s29 = smov (!%p141_p9), 1  }
   0xe   : > { %144 = sbr.rel (%p141_p9) target bundleno = 1181 (0x49d), region = 32  ;;  %s1661_s30 = smov (!%p141_p9), 127  }
   0xf   : > { %s1662_s4 = smov (!%p141_p9), 16   ;;  %s1663_s5 = smov (!%p141_p9), 112  }
  0x10   : > { %s1548_s10 = sshll.u32 (!%p141_p9), %s1705_s16, 3 }
  0x11   : > { %s1383_s11 = scalar_lea.hbm (!%p141_p9), %s2093_s3, %s1548_s10 }
  0x12   : > { %s1387_s20 = sshll.u32 (!%p141_p9), %s1383_s11, 4  ;;  %s1388_s20 = int_to_ptr.hbm [resolvable:$true] %s1387_s20 }
  0x13   : > { %s165_s24 = scalar_select %p164_p10, %s1705_s16, 1  ;;  %v169_v7 = vlaneseq  ;;  %vm252_vm4 = vcmask 1043456   ;;  %v1454_v30 = vld [vmem:[%s2091_s1 + $0xc] sm:$0xf]  ;;  %vm248_vm7 = vcmask 31744  }
  0x14   : > { %v245_v34 = vld [vmem:[%s2091_s1] sm:$0xf]  ;;  %v1463_v41 = vld [vmem:[%s2091_s1 + $0x18] sm:$0xf]  ;;  %v1468_v51 = vld [vmem:[%s2091_s1 + $0x4] sm:$0xf] }
  0x15   : > { %s1547_s25 = sshll.u32 %s165_s24, 3  ;;  %v1748_v11 = vand.u32 127, %v169_v7  ;;  %v1473_v56 = vld [vmem:[%s2091_s1 + $0x10] sm:$0xf]  ;;  %v1478_v59 = vld [vmem:[%s2091_s1 + $0x1c] sm:$0xf] }
  0x16   : > { %s168_s28 = scalar_lea.vmem %s2090_s0, %s1547_s25  ;;  %v1483_v61 = vld [vmem:[%s2091_s1 + $0x8] sm:$0xf]  ;;  %v1493_v7 = vld [vmem:[%s2091_s1 + $0x20] sm:$0xf]  ;;  %s1610_s24 = sshra.s32 %s1388_s20, 4  ;;  %s1611_s24 = int_to_ptr.hbm [resolvable:$true] %s1610_s24 }
  0x17   : > { %v1737_v0 = vld [vmem:[%s168_s28] sm:$0xff]  ;;  %v1752_v12 = vadd.s32 128, %v1748_v11  ;;  %v172_v15 = vand.u32 15, %v1748_v11  ;;  %vm193_vm0 = vcmp.lt.s32.totalorder %v1748_v11, 1  ;;  %vm205_vm1 = vcmp.lt.s32.totalorder %v1748_v11, 127  ;;  %s1612_s25 = scalar_lea.hbm %s1611_s24, 8  ;;  %p1617_p0 = scmp.lt.s32.totalorder %s1611_s24, %s2093_s3 }
  0x18   : > { %184 = vst [vmem:[#allocation1] ss:$2 sm:$0xff] %v1737_v0  ;;  %vm178_vm8 = vcmp.lt.s32.totalorder %v1748_v11, 16  ;;  %vm230_vm9 = vcmp.lt.s32.totalorder %v1748_v11, 112  ;;  %v1537_v11 = vld [vmem:[%s2092_s2 + $0x20] sm:$0xf]  ;;  %p1613_p11 = scmp.ne.s32.totalorder %s1611_s24, %s1612_s25 }
  0x19   : > { %v173_v14 = vand.u32 15, %v1752_v12  ;;  %vm1762_vm3 = vcmp.eq.s32.totalorder %v172_v15, 0  ;;  %vm1790_vm6 = vcmp.eq.s32.totalorder %v172_v15, 15  ;;  %vm181_vm10 = vcmp.ge.s32.totalorder %v1752_v12, 240  ;;  %s1616_s28 = scalar_lea.hbm %s2093_s3, 16 }
  0x1a   : > { %p1614_p12 = pnand %p1613_p11, %p1722_p5  ;;  %p1618_p1 = scmp.lt.s32.totalorder %s1616_s28, %s1612_s25 }
  0x1b   : > { %vm1758_vm2 = vcmp.eq.s32.totalorder %v173_v14, 0  ;;  %vm1786_vm5 = vcmp.eq.s32.totalorder %v173_v14, 15 }
  0x1c   : > { %p1615_p13 = pneg %p1614_p12  ;;  %p1619_p2 = por %p1618_p1, %p1617_p0 }
  0x1e   : > { %p1620_p3 = pnand %p1619_p2, %p1615_p13 }
  0x1f   : > { %v185_v1 = vld.sshfl [vmem:[#allocation1] sm:$0xff pattern:$0x75316420]  ;;  %v186_v2 = vld.sshfl [vmem:[#allocation1 + $0x8] sm:$0xff pattern:$0x75316420] }
  0x20   : > { %189 = vrot.lane.b32.xlu0 %v185_v1, %s1660_s29  ;;  %196 = vst [vmem:[#allocation1] ss:$2 sm:$0xff] %v1737_v0  ;;  %v1488_v1 = vld [vmem:[%s2091_s1 + $0x14] sm:$0xf] }
  0x27   : > { %v197_v3 = vld.sshfl [vmem:[#allocation1] sm:$0xff pattern:$0x75316420]  ;;  %v198_v4 = vld.sshfl [vmem:[#allocation1 + $0x8] sm:$0xff pattern:$0x75316420] }
  0x28   : > { %191 = vrot.lane.b32.xlu0 %v186_v2, %s1660_s29  ;;  %201 = vrot.lane.b32.xlu1 %v197_v3, %s1661_s30  ;;  %401 = vst [vmem:[#allocation1] ss:$2 sm:$0xff] %v1737_v0 }
  0x2f   : > { %v402_v5 = vld.sshfl [vmem:[#allocation1] sm:$0xff pattern:$0x75316420]  ;;  %v403_v6 = vld.sshfl [vmem:[#allocation1 + $0x8] sm:$0xff pattern:$0x75316420] }
  0x30   : > { %203 = vrot.lane.b32.xlu1 %v198_v4, %s1661_s30  ;;  %406 = vrot.lane.b32.xlu2 %v402_v5, %s1662_s4  ;;  %412 = vst [vmem:[#allocation1] ss:$2 sm:$0xff] %v1737_v0 }
  0x37   : > { %v413_v9 = vld.sshfl [vmem:[#allocation1] sm:$0xff pattern:$0x75316420]  ;;  %v414_v10 = vld.sshfl [vmem:[#allocation1 + $0x8] sm:$0xff pattern:$0x75316420] }
  0x38   : > { %482 = vst [vmem:[#allocation1] ss:$2 sm:$0xff] %v1737_v0 }
  0x3f   : > { %v484_v44 = vld.sshfl [vmem:[#allocation1 + $0x8] sm:$0xff pattern:$0x75316420]  ;;  %v483_v45 = vld.sshfl [vmem:[#allocation1] sm:$0xff pattern:$0x75316420] }
  0x8a   : > { %v407_v31 = vpop.permute.xlu2 %406 }
  0x92   : > { %v190_v8 = vpop.permute.xlu0 %189 }
  0x9a   : > { %v202_v13 = vpop.permute.xlu1 %201  ;;  %v192_v16 = vpop.permute.xlu0 %191 }
  0x9b   : > { %v194_v20 = vsel %vm193_vm0, %v190_v8, %v192_v16  ;;  %v195_v21 = vsel %vm193_vm0, %v192_v16, %v190_v8 }
  0xa2   : > { %v204_v19 = vpop.permute.xlu1 %203 }
  0xa3   : > { %v206_v22 = vsel %vm205_vm1, %v202_v13, %v204_v19  ;;  %v207_v23 = vsel %vm205_vm1, %v204_v19, %v202_v13 }
  0xa4   : > { %v213_v24 = vsel %vm1758_vm2, %v207_v23, %v194_v20  ;;  %v212_v25 = vsel %vm1762_vm3, %v206_v22, %v195_v21  ;;  %v219_v28 = vsel %vm1786_vm5, %v194_v20, %v207_v23  ;;  %v218_v29 = vsel %vm1790_vm6, %v195_v21, %v206_v22 }
  0xa5   : > { %228 = vrot.lane.b32.xlu1 %v213_v24, %s1663_s5  ;;  %1457 = vmatpush.msk.msra.mxu1 %vm252_vm4, %v213_v24 }
  0xa6   : > { %226 = vrot.lane.b32.xlu0 %v212_v25, %s1663_s5  ;;  %1455 = vmatpush.msk.msra.mxu0 %vm252_vm4, %v212_v25 }
  0xa7   : > { %220 = vrot.lane.b32.xlu2 %v212_v25, %s1662_s4  ;;  %1458 = vmatmul.msk.f32.vlgmr.msra.gmra.mxu1 %vm248_vm7, %v1454_v30 }
  0xa8   : > { %1456 = vmatmul.msk.f32.vlgmr.msra.gmra.mxu0 %vm248_vm7, %v1454_v30 }
  0xad   : > { %417 = vrot.lane.b32.xlu1 %v413_v9, %s1663_s5 }
  0xae   : > { %408 = vrot.lane.b32.xlu0 %v403_v6, %s1662_s4 }
  0xaf   : > { %222 = vrot.lane.b32.xlu2 %v213_v24, %s1662_s4 }
  0xb5   : > { %589 = vrot.lane.b32.xlu1 %v219_v28, %s1662_s4 }
  0xb6   : > { %587 = vrot.lane.b32.xlu0 %v218_v29, %s1662_s4 }
  0xb7   : > { %419 = vrot.lane.b32.xlu2 %v414_v10, %s1663_s5 }
  0xbe   : > { %595 = vrot.lane.b32.xlu0 %v219_v28, %s1663_s5 }
  0xbf   : > { %593 = vrot.lane.b32.xlu2 %v218_v29, %s1663_s5 }
 0x101   : > { %v221_v32 = vpop.permute.xlu2 %220 }
 0x109   : > { %v223_v33 = vpop.permute.xlu2 %222 }
 0x10a   : > { %v224_v35 = vsel %vm178_vm8, %v221_v32, %v223_v33  ;;  %v225_v38 = vsel %vm178_vm8, %v223_v33, %v221_v32 }
 0x10b   : > { %1461 = vmatpush.msk.msra.mxu3 %vm252_vm4, %v224_v35 }
 0x10c   : > { %1462 = vmatmul.msk.f32.vlgmr.msra.gmra.mxu3 %vm248_vm7, %v245_v34 }
 0x111   : > { %v420_v46 = vpop.permute.xlu2 %419 }
 0x117   : > { %v229_v36 = vpop.permute.xlu1 %228 }
 0x118   : > { %v227_v37 = vpop.permute.xlu0 %226 }
 0x119   : > { %v232_v39 = vsel %vm230_vm9, %v229_v36, %v227_v37  ;;  %v231_v40 = vsel %vm230_vm9, %v227_v37, %v229_v36  ;;  %v594_v62 = vpop.permute.xlu2 %593 }
 0x11a   : > { %1464 = vmatpush.msk.msrb.mxu0 %vm252_vm4, %v231_v40  ;;  %v237_v42 = vsel %vm178_vm8, %v231_v40, %v225_v38  ;;  %v244_v43 = vsel %vm181_vm10, %v224_v35, %v232_v39 }
 0x11b   : > { %1459 = vmatpush.msk.msra.mxu2 %vm252_vm4, %v237_v42  ;;  %1466 = vmatpush.msk.msrb.mxu1 %vm252_vm4, %v244_v43 }
 0x11c   : > { %1460 = vmatmul.msk.f32.vlgmr.msra.gmra.mxu2 %vm248_vm7, %v245_v34  ;;  %1467 = vmatmul.msk.f32.vlgmr.msrb.gmra.mxu1 %vm248_vm7, %v1463_v41 }
 0x11d   : > { %1465 = vmatmul.msk.f32.vlgmr.msrb.gmra.mxu0 %vm248_vm7, %v1463_v41  ;;  %1476 = vmatpush.msk.msra.mxu1 %vm252_vm4, %v484_v44 }
 0x11e   : > { %1474 = vmatpush.msk.msra.mxu0 %vm252_vm4, %v483_v45 }
 0x11f   : > { %v418_v47 = vpop.permute.xlu1 %417 }
 0x120   : > { %v409_v48 = vpop.permute.xlu0 %408  ;;  %v421_v49 = vsel %vm230_vm9, %v418_v47, %v420_v46  ;;  %v422_v50 = vsel %vm230_vm9, %v420_v46, %v418_v47 }
 0x121   : > { %v411_v52 = vsel %vm178_vm8, %v409_v48, %v407_v31  ;;  %v410_v53 = vsel %vm178_vm8, %v407_v31, %v409_v48 }
 0x122   : > { %v426_v54 = vsel %vm181_vm10, %v410_v53, %v422_v50  ;;  %1471 = vmatpush.msk.msrb.mxu3 %vm252_vm4, %v410_v53  ;;  %v423_v55 = vsel %vm178_vm8, %v421_v49, %v411_v52 }
 0x123   : > { %1469 = vmatpush.msk.msrb.mxu2 %vm252_vm4, %v423_v55  ;;  %1472 = vmatmul.msk.f32.vlgmr.msrb.gmra.mxu3 %vm248_vm7, %v1468_v51 }
 0x124   : > { %1481 = vmatpush.msk.msra.mxu3 %vm252_vm4, %v426_v54  ;;  %1470 = vmatmul.msk.f32.vlgmr.msrb.gmra.mxu2 %vm248_vm7, %v1468_v51  ;;  %v296_v8 = vpop.f32.mrf.mxu1 }
 0x125   : > { %1479 = vmatpush.msk.msra.mxu2 %vm252_vm4, %v421_v49  ;;  %1477 = vmatmul.msk.f32.vlgmr.msra.gmra.mxu1 %vm248_vm7, %v1473_v56  ;;  %v276_v9 = vpop.f32.mrf.mxu0 }
 0x126   : > { %1491 = vmatpush.msk.msrb.mxu3 %vm252_vm4, %v219_v28  ;;  %1475 = vmatmul.msk.f32.vlgmr.msra.gmra.mxu0 %vm248_vm7, %v1473_v56 }
 0x127   : > { %1489 = vmatpush.msk.msrb.mxu2 %vm252_vm4, %v218_v29  ;;  %v590_v57 = vpop.permute.xlu1 %589 }
 0x128   : > { %v588_v58 = vpop.permute.xlu0 %587 }
 0x129   : > { %v591_v60 = vsel %vm178_vm8, %v588_v58, %v590_v57  ;;  %v592_v2 = vsel %vm178_vm8, %v590_v57, %v588_v58 }
 0x12a   : > { %1486 = vmatpush.msk.msrb.mxu1 %vm252_vm4, %v591_v60 }
 0x12b   : > { %1482 = vmatmul.msk.f32.vlgmr.msra.gmra.mxu3 %vm248_vm7, %v1478_v59 }
 0x12c   : > { %1480 = vmatmul.msk.f32.vlgmr.msra.gmra.mxu2 %vm248_vm7, %v1478_v59 }
 0x12d   : > { %1487 = vmatmul.msk.f32.vlgmr.msrb.gmra.mxu1 %vm248_vm7, %v1483_v61 }
 0x130   : > { %v596_v63 = vpop.permute.xlu0 %595 }
 0x131   : > { %v597_v3 = vsel %vm230_vm9, %v594_v62, %v596_v63  ;;  %v598_v4 = vsel %vm230_vm9, %v596_v63, %v594_v62 }
 0x132   : > { %v599_v5 = vsel %vm178_vm8, %v597_v3, %v592_v2  ;;  %v602_v6 = vsel %vm181_vm10, %v591_v60, %v598_v4 }
 0x133   : > { %1484 = vmatpush.msk.msrb.mxu0 %vm252_vm4, %v599_v5  ;;  %1492 = vmatmul.msk.f32.vlgmr.msrb.gmra.mxu3 %vm248_vm7, %v1488_v1 }
 0x134   : > { %1496 = vmatpush.msk.msra.mxu1 %vm252_vm4, %v602_v6  ;;  %1485 = vmatmul.msk.f32.vlgmr.msrb.gmra.mxu0 %vm248_vm7, %v1483_v61 }
 0x135   : > { %1490 = vmatmul.msk.f32.vlgmr.msrb.gmra.mxu2 %vm248_vm7, %v1488_v1  ;;  %1494 = vmatpush.msk.msra.mxu0 %vm252_vm4, %v597_v3 }
 0x136   : > { %1497 = vmatmul.msk.f32.vlgmr.msra.gmra.mxu1 %vm248_vm7, %v1493_v7 }
 0x13c   : > { %1495 = vmatmul.msk.f32.vlgmr.msra.gmra.mxu0 %vm248_vm7, %v1493_v7 }
 0x18f   : > { %v345_v14 = vpop.f32.mrf.mxu3 }
 0x190   : > { %v346_v19 = vadd.f32 %v345_v14, %v296_v8 }
 0x199   : > { %v396_v10 = vpop.f32.mrf.mxu1 }
 0x19a   : > { %v376_v13 = vpop.f32.mrf.mxu0  ;;  %v400_v24 = vadd.f32 %v396_v10, %v346_v19 }
 0x19f   : > { %v325_v15 = vpop.f32.mrf.mxu2 }
 0x1a0   : > { %v326_v21 = vadd.f32 %v325_v15, %v276_v9 }
 0x1a2   : > { %v529_v16 = vpop.f32.mrf.mxu1  ;;  %v399_v25 = vadd.f32 %v376_v13, %v326_v21 }
 0x1a3   : > { %v509_v23 = vpop.f32.mrf.mxu0 }
 0x1a6   : > { %v475_v20 = vpop.f32.mrf.mxu3 }
 0x1a7   : > { %v455_v22 = vpop.f32.mrf.mxu2  ;;  %v479_v28 = vadd.f32 %v475_v20, %v400_v24 }
 0x1a8   : > { %v478_v30 = vadd.f32 %v455_v22, %v399_v25 }
 0x1a9   : > { %v533_v32 = vadd.f32 %v529_v16, %v479_v28 }
 0x1aa   : > { %v651_v29 = vpop.f32.mrf.mxu1  ;;  %v532_v34 = vadd.f32 %v509_v23, %v478_v30  ;;  %v1498_v30 = vld [vmem:[%s2092_s2 + $0xc] sm:$0xf] }
 0x1ae   : > { %v582_v31 = vpop.f32.mrf.mxu3 }
 0x1af   : > { %v562_v33 = vpop.f32.mrf.mxu2  ;;  %v586_v35 = vadd.f32 %v582_v31, %v533_v32 }
 0x1b0   : > { %v585_v37 = vadd.f32 %v562_v33, %v532_v34 }
 0x1b1   : > { %v631_v36 = vpop.f32.mrf.mxu0  ;;  %v655_v38 = vadd.f32 %v651_v29, %v586_v35  ;;  %v828_v35 = vld [vmem:[%s2092_s2] sm:$0xf] }
 0x1b2   : > { %v654_v41 = vadd.f32 %v631_v36, %v585_v37 }
 0x1b3   : > { %v757_v40 = vpop.f32.mrf.mxu1 }
 0x1b6   : > { %v704_v39 = vpop.f32.mrf.mxu3 }
 0x1b7   : > { %v708_v42 = vadd.f32 %v704_v39, %v655_v38 }
 0x1b8   : > { %v684_v43 = vpop.f32.mrf.mxu2 }
 0x1b9   : > { %v707_v44 = vadd.f32 %v684_v43, %v654_v41  ;;  %v761_v45 = vadd.f32 %v757_v40, %v708_v42  ;;  %v737_v46 = vpop.f32.mrf.mxu0  ;;  %v1507_v41 = vld [vmem:[%s2092_s2 + $0x18] sm:$0xf] }
 0x1bb   : > { %v760_v47 = vadd.f32 %v737_v46, %v707_v44  ;;  %v763_v48 = vsel %vm252_vm4, %v761_v45, 0.0  ;;  %v769_v49 = vmul.f32 %v761_v45, %v761_v45 }
 0x1bd   : > { %v762_v50 = vsel %vm252_vm4, %v760_v47, 0.0  ;;  %v768_v51 = vmul.f32 %v760_v47, %v760_v47  ;;  %v771_v52 = vsel %vm252_vm4, %v769_v49, 0.0 }
 0x1be   : > { %v764_v53 = vadd.f32 %v763_v48, %v762_v50 }
 0x1bf   : > { %v770_v54 = vsel %vm252_vm4, %v768_v51, 0.0  ;;  %v1512_v51 = vld [vmem:[%s2092_s2 + $0x4] sm:$0xf] }
 0x1c0   : > { %765 = vadd.xlane.f32.xlu1 %v764_v53  ;;  %v772_v55 = vadd.f32 %v771_v52, %v770_v54  ;;  %v1517_v54 = vld [vmem:[%s2092_s2 + $0x10] sm:$0xf] }
 0x1c2   : > { %773 = vadd.xlane.f32.xlu2 %v772_v55 }
 0x233   : > { %v766_v56 = vpop.xlane.xlu1 %765 }
 0x234   : > { %v767_v57 = vmul.f32 0.00390625, %v766_v56  ;;  %v1522_v56 = vld [vmem:[%s2092_s2 + $0x1c] sm:$0xf] }
 0x235   : > { %v774_v58 = vpop.xlane.xlu2 %773 }
 0x236   : > { %v775_v59 = vmul.f32 0.00390625, %v774_v58  ;;  %v776_v60 = vmul.f32 %v767_v57, %v767_v57  ;;  %v779_v7 = vsub.f32 %v760_v47, %v767_v57  ;;  %v780_v13 = vsub.f32 %v761_v45, %v767_v57 }
 0x238   : > { %v777_v61 = vsub.f32 %v775_v59, %v776_v60 }
 0x23a   : > { %v778_v62 = vmax.f32 %v777_v61, 0.0 }
 0x23c   : > { %v781_v63 = vadd.f32 1e-05, %v778_v62  ;;  %v1527_v62 = vld [vmem:[%s2092_s2 + $0x8] sm:$0xf] }
 0x23e   : > { %1592 = vrsqrt.f32 %v781_v63  ;;  %vm788_vm12 = vweird.f32 %v781_v63 }
 0x244   : > { %v1593_v1 = vpop.eup %1592 }
 0x245   : > { %v783_v2 = vmul.f32 %v1593_v1, %v781_v63  ;;  %vm789_vm11 = vweird.f32 %v1593_v1 }
 0x246   : > { %vm790_vm13 = vmor %vm788_vm12, %vm789_vm11 }
 0x247   : > { %v784_v3 = vmul.f32 %v1593_v1, %v783_v2  ;;  %v1532_v2 = vld [vmem:[%s2092_s2 + $0x14] sm:$0xf] }
 0x249   : > { %v785_v4 = vmul.f32 0.5, %v784_v3 }
 0x24b   : > { %v786_v5 = vsub.f32 1.5, %v785_v4 }
 0x24d   : > { %v787_v6 = vmul.f32 %v1593_v1, %v786_v5 }
 0x24f   : > { %v791_v8 = vsel %vm790_vm13, %v1593_v1, %v787_v6 }
 0x250   : > { %v792_v9 = vmul.f32 %v791_v8, %v779_v7  ;;  %v793_v14 = vmul.f32 %v791_v8, %v780_v13 }
 0x252   : > { %v1907_v10 = vmax.f32 %v792_v9, 0.0  ;;  %v1911_v15 = vmax.f32 %v793_v14, 0.0 }
 0x254   : > { %796 = vrot.lane.b32.xlu0 %v1907_v10, %s1660_s29 }
 0x25c   : > { %798 = vrot.lane.b32.xlu0 %v1911_v15, %s1660_s29  ;;  %s161_s29 = sand.u32 1, %s1650_s13  }
 0x25d   : > { %s1372_s16 = scalar_lea.sflag [#allocation3], %s161_s29 }
 0x264   : > { %802 = vrot.lane.b32.xlu0 %v1907_v10, %s1661_s30 }
 0x26c   : > { %804 = vrot.lane.b32.xlu0 %v1911_v15, %s1661_s30  ;;  %s1451_s30 = sshll.u32 %s161_s29, 3 }
 0x26d   : > { %s163_s17 = scalar_lea.vmem [#allocation2], %s1451_s30 }
 0x26e   : > { %s1385_s19 = sshll.u32 %s163_s17, 4  ;;  %s1386_s19 = int_to_ptr.vmem [resolvable:$true] %s1385_s19 }
 0x274   : > { %982 = vrot.lane.b32.xlu0 %v1907_v10, %s1662_s4 }
 0x27c   : > { %984 = vrot.lane.b32.xlu0 %v1911_v15, %s1662_s4 }
 0x2c6   : > { %v797_v16 = vpop.permute.xlu0 %796 }
 0x2ce   : > { %v799_v19 = vpop.permute.xlu0 %798 }
 0x2cf   : > { %v800_v22 = vsel %vm193_vm0, %v797_v16, %v799_v19  ;;  %v801_v23 = vsel %vm193_vm0, %v799_v19, %v797_v16 }
 0x2d6   : > { %v803_v20 = vpop.permute.xlu0 %802 }
 0x2de   : > { %v805_v21 = vpop.permute.xlu0 %804 }
 0x2df   : > { %v806_v24 = vsel %vm205_vm1, %v803_v20, %v805_v21  ;;  %v807_v25 = vsel %vm205_vm1, %v805_v21, %v803_v20 }
 0x2e0   : > { %v809_v28 = vsel %vm1758_vm2, %v807_v25, %v800_v22  ;;  %v808_v29 = vsel %vm1762_vm3, %v806_v24, %v801_v23  ;;  %v811_v17 = vsel %vm1786_vm5, %v800_v22, %v807_v25  ;;  %v810_v18 = vsel %vm1790_vm6, %v801_v23, %v806_v24 }
 0x2e1   : > { %814 = vrot.lane.b32.xlu2 %v809_v28, %s1662_s4  ;;  %1501 = vmatpush.msk.msra.mxu3 %vm252_vm4, %v809_v28 }
 0x2e2   : > { %818 = vrot.lane.b32.xlu1 %v808_v29, %s1663_s5  ;;  %812 = vrot.lane.b32.xlu0 %v808_v29, %s1662_s4 }
 0x2e3   : > { %1499 = vmatpush.msk.msra.mxu2 %vm252_vm4, %v808_v29  ;;  %1502 = vmatmul.msk.f32.vlgmr.msra.gmra.mxu3 %vm248_vm7, %v1498_v30 }
 0x2e4   : > { %1500 = vmatmul.msk.f32.vlgmr.msra.gmra.mxu2 %vm248_vm7, %v1498_v30 }
 0x2e6   : > { %v983_v26 = vpop.permute.xlu0 %982 }
 0x2e9   : > { %988 = vrot.lane.b32.xlu2 %v1907_v10, %s1663_s5 }
 0x2ea   : > { %990 = vrot.lane.b32.xlu1 %v1911_v15, %s1663_s5  ;;  %820 = vrot.lane.b32.xlu0 %v809_v28, %s1663_s5 }
 0x2ee   : > { %v985_v31 = vpop.permute.xlu0 %984 }
 0x2ef   : > { %v986_v36 = vsel %vm178_vm8, %v983_v26, %v985_v31  ;;  %v987_v46 = vsel %vm178_vm8, %v985_v31, %v983_v26 }
 0x2f1   : > { %1159 = vrot.lane.b32.xlu2 %v811_v17, %s1662_s4 }
 0x2f2   : > { %1163 = vrot.lane.b32.xlu1 %v810_v18, %s1663_s5  ;;  %1157 = vrot.lane.b32.xlu0 %v810_v18, %s1662_s4 }
 0x2fa   : > { %1165 = vrot.lane.b32.xlu0 %v811_v17, %s1663_s5 }
 0x33b   : > { %v815_v32 = vpop.permute.xlu2 %814 }
 0x343   : > { %v989_v37 = vpop.permute.xlu2 %988 }
 0x34b   : > { %v1160_v52 = vpop.permute.xlu2 %1159 }
 0x354   : > { %v819_v33 = vpop.permute.xlu1 %818  ;;  %v813_v27 = vpop.permute.xlu0 %812 }
 0x355   : > { %v816_v34 = vsel %vm178_vm8, %v813_v27, %v815_v32  ;;  %v817_v38 = vsel %vm178_vm8, %v815_v32, %v813_v27 }
 0x356   : > { %1505 = vmatpush.msk.msrb.mxu1 %vm252_vm4, %v816_v34 }
 0x357   : > { %1506 = vmatmul.msk.f32.vlgmr.msrb.gmra.mxu1 %vm248_vm7, %v828_v35 }
 0x358   : > { %1515 = vmatpush.msk.msra.mxu1 %vm252_vm4, %v986_v36 }
 0x35c   : > { %v991_v39 = vpop.permute.xlu1 %990  ;;  %v821_v40 = vpop.permute.xlu0 %820 }
 0x35d   : > { %v992_v42 = vsel %vm230_vm9, %v989_v37, %v991_v39  ;;  %v993_v43 = vsel %vm230_vm9, %v991_v39, %v989_v37  ;;  %v822_v44 = vsel %vm230_vm9, %v819_v33, %v821_v40  ;;  %v823_v45 = vsel %vm230_vm9, %v821_v40, %v819_v33 }
 0x35e   : > { %v997_v47 = vsel %vm181_vm10, %v986_v36, %v993_v43  ;;  %v824_v48 = vsel %vm178_vm8, %v822_v44, %v817_v38  ;;  %v827_v49 = vsel %vm181_vm10, %v816_v34, %v823_v45  ;;  %1508 = vmatpush.msk.msrb.mxu2 %vm252_vm4, %v822_v44  ;;  %v994_v50 = vsel %vm178_vm8, %v992_v42, %v987_v46 }
 0x35f   : > { %1503 = vmatpush.msk.msrb.mxu0 %vm252_vm4, %v824_v48  ;;  %1509 = vmatmul.msk.f32.vlgmr.msrb.gmra.mxu2 %vm248_vm7, %v1507_v41 }
 0x360   : > { %1510 = vmatpush.msk.msrb.mxu3 %vm252_vm4, %v827_v49  ;;  %1518 = vmatpush.msk.msra.mxu2 %vm252_vm4, %v1907_v10 }
 0x361   : > { %1525 = vmatpush.msk.msrb.mxu1 %vm252_vm4, %v997_v47  ;;  %1504 = vmatmul.msk.f32.vlgmr.msrb.gmra.mxu0 %vm248_vm7, %v828_v35 }
 0x362   : > { %1511 = vmatmul.msk.f32.vlgmr.msrb.gmra.mxu3 %vm248_vm7, %v1507_v41  ;;  %1513 = vmatpush.msk.msra.mxu0 %vm252_vm4, %v994_v50 }
 0x363   : > { %1516 = vmatmul.msk.f32.vlgmr.msra.gmra.mxu1 %vm248_vm7, %v1512_v51  ;;  %1520 = vmatpush.msk.msra.mxu3 %vm252_vm4, %v1911_v15 }
 0x364   : > { %1535 = vmatpush.msk.msra.mxu1 %vm252_vm4, %v811_v17  ;;  %1523 = vmatpush.msk.msrb.mxu0 %vm252_vm4, %v992_v42  ;;  %v1158_v53 = vpop.permute.xlu0 %1157  ;;  %v1164_v57 = vpop.permute.xlu1 %1163 }
 0x365   : > { %v1161_v55 = vsel %vm178_vm8, %v1158_v53, %v1160_v52  ;;  %v1162_v59 = vsel %vm178_vm8, %v1160_v52, %v1158_v53 }
 0x366   : > { %1530 = vmatpush.msk.msrb.mxu3 %vm252_vm4, %v1161_v55  ;;  %v877_v3 = vpop.f32.mrf.mxu3 }
 0x367   : > { %1519 = vmatmul.msk.f32.vlgmr.msra.gmra.mxu2 %vm248_vm7, %v1517_v54  ;;  %v857_v12 = vpop.f32.mrf.mxu2 }
 0x369   : > { %1514 = vmatmul.msk.f32.vlgmr.msra.gmra.mxu0 %vm248_vm7, %v1512_v51 }
 0x36a   : > { %1521 = vmatmul.msk.f32.vlgmr.msra.gmra.mxu3 %vm248_vm7, %v1517_v54  ;;  %1533 = vmatpush.msk.msra.mxu0 %vm252_vm4, %v810_v18 }
 0x36b   : > { %1526 = vmatmul.msk.f32.vlgmr.msrb.gmra.mxu1 %vm248_vm7, %v1522_v56 }
 0x36c   : > { %v1166_v58 = vpop.permute.xlu0 %1165 }
 0x36d   : > { %v1167_v60 = vsel %vm230_vm9, %v1164_v57, %v1166_v58  ;;  %v1168_v61 = vsel %vm230_vm9, %v1166_v58, %v1164_v57 }
 0x36e   : > { %v1169_v63 = vsel %vm178_vm8, %v1167_v60, %v1162_v59  ;;  %v1172_v1 = vsel %vm181_vm10, %v1161_v55, %v1168_v61 }
 0x36f   : > { %1528 = vmatpush.msk.msrb.mxu2 %vm252_vm4, %v1169_v63  ;;  %1540 = vmatpush.msk.msra.mxu3 %vm252_vm4, %v1172_v1 }
 0x370   : > { %1529 = vmatmul.msk.f32.vlgmr.msrb.gmra.mxu2 %vm248_vm7, %v1527_v62 }
 0x371   : > { %1524 = vmatmul.msk.f32.vlgmr.msrb.gmra.mxu0 %vm248_vm7, %v1522_v56  ;;  %1538 = vmatpush.msk.msra.mxu2 %vm252_vm4, %v1167_v60 }
 0x372   : > { %1531 = vmatmul.msk.f32.vlgmr.msrb.gmra.mxu3 %vm248_vm7, %v1527_v62 }
 0x373   : > { %1536 = vmatmul.msk.f32.vlgmr.msra.gmra.mxu1 %vm248_vm7, %v1532_v2 }
 0x378   : > { %1539 = vmatmul.msk.f32.vlgmr.msra.gmra.mxu2 %vm248_vm7, %v1537_v11 }
 0x379   : > { %1534 = vmatmul.msk.f32.vlgmr.msra.gmra.mxu0 %vm248_vm7, %v1532_v2 }
 0x37a   : > { %1541 = vmatmul.msk.f32.vlgmr.msra.gmra.mxu3 %vm248_vm7, %v1537_v11 }
 0x3d4   : > { %v926_v4 = vpop.f32.mrf.mxu1 }
 0x3d5   : > { %v927_v13 = vadd.f32 %v926_v4, %v877_v3 }
 0x3de   : > { %v906_v5 = vpop.f32.mrf.mxu0 }
 0x3df   : > { %v907_v10 = vadd.f32 %v906_v5, %v857_v12 }
 0x3e0   : > { %v1046_v8 = vpop.f32.mrf.mxu1 }
 0x3e2   : > { %v957_v6 = vpop.f32.mrf.mxu2 }
 0x3e3   : > { %v980_v14 = vadd.f32 %v957_v6, %v907_v10 }
 0x3e5   : > { %v977_v7 = vpop.f32.mrf.mxu3 }
 0x3e6   : > { %v1026_v9 = vpop.f32.mrf.mxu0  ;;  %v981_v16 = vadd.f32 %v977_v7, %v927_v13 }
 0x3e7   : > { %v1049_v20 = vadd.f32 %v1026_v9, %v980_v14 }
 0x3e8   : > { %v1152_v22 = vpop.f32.mrf.mxu1  ;;  %v1050_v23 = vadd.f32 %v1046_v8, %v981_v16 }
 0x3ea   : > { %v1079_v15 = vpop.f32.mrf.mxu2 }
 0x3eb   : > { %v1102_v24 = vadd.f32 %v1079_v15, %v1049_v20 }
 0x3ed   : > { %v1099_v19 = vpop.f32.mrf.mxu3 }
 0x3ee   : > { %v1132_v21 = vpop.f32.mrf.mxu0  ;;  %v1103_v25 = vadd.f32 %v1099_v19, %v1050_v23 }
 0x3ef   : > { %v1155_v29 = vadd.f32 %v1132_v21, %v1102_v24 }
 0x3f0   : > { %v1156_v18 = vadd.f32 %v1152_v22, %v1103_v25  ;;  %v1274_v32 = vpop.f32.mrf.mxu1 }
 0x3f3   : > { %v1201_v28 = vpop.f32.mrf.mxu2 }
 0x3f4   : > { %v1224_v30 = vadd.f32 %v1201_v28, %v1155_v29 }
 0x3f5   : > { %v1221_v17 = vpop.f32.mrf.mxu3 }
 0x3f6   : > { %v1254_v26 = vpop.f32.mrf.mxu0  ;;  %v1225_v31 = vadd.f32 %v1221_v17, %v1156_v18 }
 0x3f7   : > { %v1277_v33 = vadd.f32 %v1254_v26, %v1224_v30 }
 0x3f8   : > { %v1278_v34 = vadd.f32 %v1274_v32, %v1225_v31 }
 0x3fb   : > { %v1307_v27 = vpop.f32.mrf.mxu2 }
 0x3fc   : > { %v1330_v35 = vadd.f32 %v1307_v27, %v1277_v33 }
 0x3fd   : > { %v1327_v36 = vpop.f32.mrf.mxu3 }
 0x3fe   : > { %v1331_v37 = vadd.f32 %v1327_v36, %v1278_v34  ;;  %v1332_v38 = vsel %vm252_vm4, %v1330_v35, 0.0  ;;  %v1338_v39 = vmul.f32 %v1330_v35, %v1330_v35 }
 0x400   : > { %v1333_v40 = vsel %vm252_vm4, %v1331_v37, 0.0  ;;  %v1339_v41 = vmul.f32 %v1331_v37, %v1331_v37  ;;  %v1340_v42 = vsel %vm252_vm4, %v1338_v39, 0.0 }
 0x401   : > { %v1334_v43 = vadd.f32 %v1333_v40, %v1332_v38 }
 0x402   : > { %v1341_v44 = vsel %vm252_vm4, %v1339_v41, 0.0 }
 0x403   : > { %1335 = vadd.xlane.f32.xlu2 %v1334_v43  ;;  %v1342_v45 = vadd.f32 %v1341_v44, %v1340_v42 }
 0x405   : > { %1343 = vadd.xlane.f32.xlu1 %v1342_v45 }
 0x476   : > { %v1336_v46 = vpop.xlane.xlu2 %1335 }
 0x477   : > { %v1337_v47 = vmul.f32 0.00390625, %v1336_v46 }
 0x478   : > { %v1344_v48 = vpop.xlane.xlu1 %1343 }
 0x479   : > { %v1345_v49 = vmul.f32 0.00390625, %v1344_v48  ;;  %v1346_v50 = vmul.f32 %v1337_v47, %v1337_v47  ;;  %v1350_v60 = vsub.f32 %v1331_v37, %v1337_v47  ;;  %v1349_v62 = vsub.f32 %v1330_v35, %v1337_v47 }
 0x47b   : > { %v1347_v51 = vsub.f32 %v1345_v49, %v1346_v50 }
 0x47d   : > { %v1348_v52 = vmax.f32 %v1347_v51, 0.0 }
 0x47f   : > { %v1351_v53 = vadd.f32 1e-05, %v1348_v52 }
 0x481   : > { %1594 = vrsqrt.f32 %v1351_v53  ;;  %vm1358_vm15 = vweird.f32 %v1351_v53 }
 0x487   : > { %v1595_v54 = vpop.eup %1594 }
 0x488   : > { %v1353_v55 = vmul.f32 %v1595_v54, %v1351_v53  ;;  %vm1359_vm14 = vweird.f32 %v1595_v54 }
 0x489   : > { %vm1360_vm0 = vmor %vm1358_vm15, %vm1359_vm14 }
 0x48a   : > { %v1354_v56 = vmul.f32 %v1595_v54, %v1353_v55 }
 0x48c   : > { %v1355_v57 = vmul.f32 0.5, %v1354_v56 }
 0x48e   : > { %v1356_v58 = vsub.f32 1.5, %v1355_v57 }
 0x490   : > { %v1357_v59 = vmul.f32 %v1595_v54, %v1356_v58 }
 0x492   : > { %v1361_v61 = vsel %vm1360_vm0, %v1595_v54, %v1357_v59 }
 0x493   : > { %v1363_v63 = vmul.f32 %v1361_v61, %v1350_v60  ;;  %v1362_v1 = vmul.f32 %v1361_v61, %v1349_v62 }
 0x495   : > { %v1366_v2 = vrot.slane %v1363_v63, 4 }
 0x497   : > { %v1367_v11 = vsel %vm252_vm4, %v1362_v1, %v1366_v2 }
 0x498   : > { %v1369_v12 = vadd.f32 %v1367_v11, %v1737_v0 }
 0x49a   : > { %1370 = vst [vmem:[%s163_s17] sm:$0xff] %v1369_v12 }
 0x49b   : > { %1623 = shalt.err (!%p1620_p3)
}
 0x49c   : > { %1549 = dma.vmem_to_hbm [thread:$0]  (%p1722_p5), %s1386_s19, 128, %s1388_s20, %s1372_s16  }
 0x49d PF: > { %p1555_p4 = scmp.ge.s32.totalorder %s1658_s15, 2  ;;  %s1399_s8 = sand.u32 1, %s1646_s12  }
 0x49e   : > { %s1400_s9 = scalar_lea.sflag [#allocation3], %s1399_s8 }
 0x49f   : > { %p1552_p7 = pnand %p1555_p4, %p1726_p6 }
 0x4a1   : > { %p1553_p8 = pneg %p1552_p7 }
 0x4a3   : > { %1641 = dma.done.wait (%p1553_p8), %s1400_s9, 128  }
 0x4a4   : > { %1643 = vsyncadd (%p1553_p8), %s1400_s9, 4294967168  ;;  %p13_p9 = scmp.ge.s32.totalorder %s1709_s18, 4   ;;  %s2104_s12 = smov %s1650_s13 }
 0x4a5   : > { %s2105_s13 = smov %s1654_s14  ;;  %s2106_s14 = smov %s1720_s21 }
 0x4a6   : > { %s2107_s15 = smov %s1709_s18  ;;  %15 = sbr.rel (!%p13_p9) target bundleno = 3 (0x3), region = 83 }
 0x4ab   :  { %1406 = vsyncpa [#allocation3], 1 }
 0x4ac   :  { %1408 = vsyncpa [#allocation3 + $0x1], 1 }

</bundles_post_ra>
